<compile_context>
chip_gen: v6e
topology: v6e:2x2x1
jax: 0.10.0
libtpu: 0.0.40
codegen_flags: <defaults>
</compile_context>

<pallas_src>
import math
import functools

import jax
import jax.numpy as jnp
from jax.experimental import pallas as pl
from jax.experimental.pallas import tpu as pltpu


# --------------------------------------------------------------------------
# Kernel 1: fused QKV projection
# --------------------------------------------------------------------------
def _qkv_projection_kernel(x_ref, wqkv_ref, q_ref, k_ref, v_ref):
    # x_ref: (1, TL, C) bf16 ; wqkv_ref: (C, 3C) bf16 (q columns pre-scaled)
    x = x_ref[0]                                               # (TL, C)
    w = wqkv_ref[...]                                          # (C, 3C)
    C = x.shape[-1]
    qkv = jnp.dot(x, w, preferred_element_type=jnp.float32)    # (TL, 3C) f32
    q_ref[0] = qkv[:, 0 * C:1 * C].astype(q_ref.dtype)
    k_ref[0] = qkv[:, 1 * C:2 * C].astype(k_ref.dtype)
    v_ref[0] = qkv[:, 2 * C:3 * C].astype(v_ref.dtype)


# --------------------------------------------------------------------------
# Kernel 2: multi-head attention + output projection for one query tile
# --------------------------------------------------------------------------
def _attention_kernel(q_ref, k_ref, v_ref, wout_ref, o_ref, *, num_heads):
    # q_ref: (1, TQ, C) bf16 ; k_ref/v_ref: (1, L, C) bf16 ; wout_ref: (C, C) bf16
    q = q_ref[0]                                               # (TQ, C)
    k = k_ref[0]                                               # (L, C)
    v = v_ref[0]                                               # (L, C)
    TQ, C = q.shape
    L = k.shape[0]
    H = num_heads
    D = C // H

    # Head-major batched layout: one batched contraction per stage instead of
    # H tiny (L, D) x (D, L) matmuls + a 16-way lane concatenate.
    qh = q.reshape(TQ, H, D).transpose(1, 0, 2)                # (H, TQ, D)
    kh = k.reshape(L, H, D).transpose(1, 0, 2)                 # (H, L, D)
    vh = v.reshape(L, H, D).transpose(1, 0, 2)                 # (H, L, D)

    # Scores; 1/sqrt(D) already folded into Wq in the wrapper. f32 accumulate.
    s = jnp.einsum("hqd,hkd->hqk", qh, kh,
                   preferred_element_type=jnp.float32)         # (H, TQ, L)

    # Numerically stable softmax in f32; divide on the EUP (approx reciprocal).
    m = jnp.max(s, axis=-1, keepdims=True)
    p = jnp.exp(s - m)
    denom = jnp.sum(p, axis=-1, keepdims=True)
    p = p * pl.reciprocal(denom, approx=True)

    # attn @ v, bf16 operands, f32 accumulation.
    ctx = jnp.einsum("hqk,hkd->hqd", p.astype(v.dtype), vh,
                     preferred_element_type=jnp.float32)       # (H, TQ, D)
    store = ctx.astype(v.dtype).transpose(1, 0, 2).reshape(TQ, C)  # (TQ, C) bf16

    # Output projection.
    out = jnp.dot(store, wout_ref[...],
                  preferred_element_type=jnp.float32)          # (TQ, C) f32
    o_ref[0] = out.astype(o_ref.dtype)
    # TODO(synk): attention_drop / out_drop are nn.Dropout(p=0.0) -> identity
    # here; attention_mask / is_causal (unused in the default forward) and
    # non-zero training dropout are not implemented.


# --------------------------------------------------------------------------
# Wrapper
# --------------------------------------------------------------------------
def self_attention_pallas(x, w_qkv, w_out, num_heads, *, seq_tile=None):
    """x: (B, L, C) f32; w_qkv: (3C, C), w_out: (C, C) in PyTorch (out, in) layout."""
    B, L, C = x.shape
    H = num_heads
    D = C // H
    scale = 1.0 / math.sqrt(D)

    if seq_tile is None:
        seq_tile = min(L, 256)
    # bf16 blocks need the sublane dim to be a multiple of 16 (or the full L).
    if L % seq_tile != 0 or seq_tile % 16 != 0:
        seq_tile = L
    TL = TQ = seq_tile

    # Pre-transpose to (in, out) so kernels compute x @ W, and fold the
    # softmax scale into the q columns (removes an O(H*L*L) VPU multiply).
    wqkv_t = w_qkv.T.astype(jnp.float32)
    wqkv_t = wqkv_t.at[:, :C].multiply(scale)

    # bf16 MXU operands everywhere; accumulation stays f32 in-kernel.
    x_bf = x.astype(jnp.bfloat16)
    wqkv_bf = wqkv_t.astype(jnp.bfloat16)
    wout_bf = w_out.T.astype(jnp.bfloat16)

    # ---- kernel 1: fused QKV projection ---------------------------------
    qkv_cost = pl.CostEstimate(
        flops=2 * B * L * C * 3 * C,
        transcendentals=0,
        bytes_accessed=2 * (B * L * C + C * 3 * C + 3 * B * L * C))
    q, k, v = pl.pallas_call(
        _qkv_projection_kernel,
        out_shape=tuple(jax.ShapeDtypeStruct((B, L, C), jnp.bfloat16)
                        for _ in range(3)),
        grid_spec=pltpu.PrefetchScalarGridSpec(
            num_scalar_prefetch=0,
            grid=(B, L // TL),
            in_specs=[
                pl.BlockSpec((1, TL, C), lambda b, i: (b, i, 0)),
                # Constant index_map: weight tile is DMA'd once, not per step.
                pl.BlockSpec((C, 3 * C), lambda b, i: (0, 0)),
            ],
            out_specs=[pl.BlockSpec((1, TL, C), lambda b, i: (b, i, 0))] * 3,
        ),
        compiler_params=pltpu.CompilerParams(
            dimension_semantics=("parallel", "parallel")),
        cost_estimate=qkv_cost,
    )(x_bf, wqkv_bf)

    # ---- kernel 2: attention + output projection ------------------------
    attn_cost = pl.CostEstimate(
        flops=4 * B * L * L * C + 2 * B * L * C * C,
        transcendentals=B * H * L * L,
        bytes_accessed=2 * B * L * C * (1 + 2 * (L // TQ))
                       + 2 * C * C + 4 * B * L * C)
    kernel = functools.partial(_attention_kernel, num_heads=num_heads)
    out = pl.pallas_call(
        kernel,
        out_shape=jax.ShapeDtypeStruct((B, L, C), jnp.float32),
        grid_spec=pltpu.PrefetchScalarGridSpec(
            num_scalar_prefetch=0,
            grid=(B, L // TQ),
            in_specs=[
                pl.BlockSpec((1, TQ, C), lambda b, i: (b, i, 0)),   # q tile
                pl.BlockSpec((1, L, C), lambda b, i: (b, 0, 0)),    # full K
                pl.BlockSpec((1, L, C), lambda b, i: (b, 0, 0)),    # full V
                pl.BlockSpec((C, C), lambda b, i: (0, 0)),          # Wout
            ],
            out_specs=pl.BlockSpec((1, TQ, C), lambda b, i: (b, i, 0)),
        ),
        compiler_params=pltpu.CompilerParams(
            dimension_semantics=("parallel", "parallel")),
        cost_estimate=attn_cost,
    )(q, k, v, wout_bf)
    # TODO(synk): for long sequences, tile K/V with a flash-style online-softmax
    # inner loop instead of keeping the full (L, C) K/V resident per block.
    return out


# --------------------------------------------------------------------------
# Reference + test harness
# --------------------------------------------------------------------------
def _xavier_uniform(key, shape):
    # shape = (fan_out, fan_in) as in nn.Linear.weight
    fan_out, fan_in = shape
    bound = math.sqrt(6.0 / (fan_in + fan_out))
    return jax.random.uniform(key, shape, jnp.float32, -bound, bound)


def _reference(x, w_qkv, w_out, num_heads):
    B, L, C = x.shape
    D = C // num_heads
    qkv = x @ w_qkv.T                                     # (B, L, 3C)
    q, k, v = jnp.split(qkv, 3, axis=-1)

    def heads(t):
        return t.reshape(B, L, num_heads, D).transpose(0, 2, 1, 3)  # (B,H,L,D)

    q, k, v = heads(q), heads(k), heads(v)
    scores = (1.0 / math.sqrt(D)) * jnp.einsum("bhld,bhmd->bhlm", q, k)
    attn = jax.nn.softmax(scores, axis=-1)
    store = jnp.einsum("bhlm,bhmd->bhld", attn, v)
    store = store.transpose(0, 2, 1, 3).reshape(B, L, C)
    return store @ w_out.T


if __name__ == "__main__":
    # Small shapes consistent with the module: num_heads=16 (default), dim=128.
    B, L, C = 2, 32, 128
    num_heads = 16

    key = jax.random.PRNGKey(0)
    kx, kw1, kw2 = jax.random.split(key, 3)

    x = jax.random.normal(kx, (B, L, C), jnp.float32)

    # PyTorch nn.Linear weights: (out_features, in_features), xavier_uniform.
    w_qkv = _xavier_uniform(kw1, (3 * C, C))   # input_projection_layer.weight
    w_out = _xavier_uniform(kw2, (C, C))       # output_projection_layer.weight
    # qkv_bias=False -> no biases.

    out = self_attention_pallas(x, w_qkv, w_out, num_heads, seq_tile=16)
    out = jax.block_until_ready(out)

    ref = _reference(x, w_qkv, w_out, num_heads)
    assert out.shape == (B, L, C)
    max_err = float(jnp.max(jnp.abs(out - ref)))
    # bf16 MXU operands (f32 accumulation) -> tolerance looser than pure f32.
    assert jnp.allclose(out, ref, atol=5e-2, rtol=5e-2), max_err

    print("KERNEL_OK")
</pallas_src>

<mosaic_0001>
module attributes {stable_mosaic.version = 11 : i64} {
  func.func @_qkv_projection_kernel(%arg0: i32, %arg1: i32, %arg2: memref<1x16x128xbf16, #tpu.memory_space<vmem>>, %arg3: memref<128x384xbf16, #tpu.memory_space<vmem>>, %arg4: memref<1x16x128xbf16, #tpu.memory_space<vmem>>, %arg5: memref<1x16x128xbf16, #tpu.memory_space<vmem>>, %arg6: memref<1x16x128xbf16, #tpu.memory_space<vmem>>) attributes {dimension_semantics = [#tpu.dimension_semantics<parallel>, #tpu.dimension_semantics<parallel>], iteration_bounds = array<i64: 2, 2>, scalar_prefetch = 0 : i64, scratch_operands = 0 : i64, tpu.core_type = #tpu.core_type<tc>, window_params = [{transform_indices = @transform_0, window_bounds = array<i64: 1, 16, 128>}, {pipeline_mode = #tpu.pipeline_mode<synchronous>, transform_indices = @transform_1, window_bounds = array<i64: 128, 384>}, {transform_indices = @transform_2, window_bounds = array<i64: 1, 16, 128>}, {transform_indices = @transform_3, window_bounds = array<i64: 1, 16, 128>}, {transform_indices = @transform_4, window_bounds = array<i64: 1, 16, 128>}]} {
    %c0 = arith.constant 0 : index
    %c0_0 = arith.constant 0 : index
    %c0_1 = arith.constant 0 : index
    %0 = vector.load %arg2[%c0, %c0_0, %c0_1] : memref<1x16x128xbf16, #tpu.memory_space<vmem>>, vector<1x16x128xbf16>
    %1 = vector.shape_cast %0 : vector<1x16x128xbf16> to vector<16x128xbf16>
    %c0_2 = arith.constant 0 : index
    %c0_3 = arith.constant 0 : index
    %2 = vector.load %arg3[%c0_2, %c0_3] : memref<128x384xbf16, #tpu.memory_space<vmem>>, vector<128x384xbf16>
    %cst = arith.constant dense<0.000000e+00> : vector<16x384xf32>
    %3 = tpu.matmul %1, %2, %cst {dimension_numbers = #tpu.dot_dimension_numbers<[1], [0], [0], [1], [0, 0, 1, 1], [], []>} : vector<16x128xbf16>, vector<128x384xbf16>, vector<16x384xf32> -> vector<16x384xf32>
    %4 = vector.extract_strided_slice %3 {offsets = [0, 0], sizes = [16, 128], strides = [1, 1]} : vector<16x384xf32> to vector<16x128xf32>
    %5 = arith.truncf %4 : vector<16x128xf32> to vector<16x128xbf16>
    %c0_4 = arith.constant 0 : index
    %c0_5 = arith.constant 0 : index
    %c0_6 = arith.constant 0 : index
    %6 = vector.load %arg4[%c0_4, %c0_5, %c0_6] : memref<1x16x128xbf16, #tpu.memory_space<vmem>>, vector<1x16x128xbf16>
    %7 = vector.shape_cast %6 : vector<1x16x128xbf16> to vector<16x128xbf16>
    %8 = vector.shape_cast %5 : vector<16x128xbf16> to vector<1x16x128xbf16>
    tpu.vector_store %arg4[%c0_4, %c0_5, %c0_6], %8 {strides = array<i32>} : memref<1x16x128xbf16, #tpu.memory_space<vmem>>, vector<1x16x128xbf16>,
    %9 = vector.extract_strided_slice %3 {offsets = [0, 128], sizes = [16, 128], strides = [1, 1]} : vector<16x384xf32> to vector<16x128xf32>
    %10 = arith.truncf %9 : vector<16x128xf32> to vector<16x128xbf16>
    %c0_7 = arith.constant 0 : index
    %c0_8 = arith.constant 0 : index
    %c0_9 = arith.constant 0 : index
    %11 = vector.load %arg5[%c0_7, %c0_8, %c0_9] : memref<1x16x128xbf16, #tpu.memory_space<vmem>>, vector<1x16x128xbf16>
    %12 = vector.shape_cast %11 : vector<1x16x128xbf16> to vector<16x128xbf16>
    %13 = vector.shape_cast %10 : vector<16x128xbf16> to vector<1x16x128xbf16>
    tpu.vector_store %arg5[%c0_7, %c0_8, %c0_9], %13 {strides = array<i32>} : memref<1x16x128xbf16, #tpu.memory_space<vmem>>, vector<1x16x128xbf16>,
    %14 = vector.extract_strided_slice %3 {offsets = [0, 256], sizes = [16, 128], strides = [1, 1]} : vector<16x384xf32> to vector<16x128xf32>
    %15 = arith.truncf %14 : vector<16x128xf32> to vector<16x128xbf16>
    %c0_10 = arith.constant 0 : index
    %c0_11 = arith.constant 0 : index
    %c0_12 = arith.constant 0 : index
    %16 = vector.load %arg6[%c0_10, %c0_11, %c0_12] : memref<1x16x128xbf16, #tpu.memory_space<vmem>>, vector<1x16x128xbf16>
    %17 = vector.shape_cast %16 : vector<1x16x128xbf16> to vector<16x128xbf16>
    %18 = vector.shape_cast %15 : vector<16x128xbf16> to vector<1x16x128xbf16>
    tpu.vector_store %arg6[%c0_10, %c0_11, %c0_12], %18 {strides = array<i32>} : memref<1x16x128xbf16, #tpu.memory_space<vmem>>, vector<1x16x128xbf16>,
    return
  }
  func.func @transform_0(%arg0: i32, %arg1: i32) -> (i32, i32, i32) {
    %c0_i32 = arith.constant 0 : i32
    %c0_i32_0 = arith.constant 0 : i32
    return %arg0, %arg1, %c0_i32 : i32, i32, i32
  }
  func.func @transform_1(%arg0: i32, %arg1: i32) -> (i32, i32) {
    %c0_i32 = arith.constant 0 : i32
    %c0_i32_0 = arith.constant 0 : i32
    %c0_i32_1 = arith.constant 0 : i32
    return %c0_i32, %c0_i32_0 : i32, i32
  }
  func.func @transform_2(%arg0: i32, %arg1: i32) -> (i32, i32, i32) {
    %c0_i32 = arith.constant 0 : i32
    %c0_i32_0 = arith.constant 0 : i32
    return %arg0, %arg1, %c0_i32 : i32, i32, i32
  }
  func.func @transform_3(%arg0: i32, %arg1: i32) -> (i32, i32, i32) {
    %c0_i32 = arith.constant 0 : i32
    %c0_i32_0 = arith.constant 0 : i32
    return %arg0, %arg1, %c0_i32 : i32, i32, i32
  }
  func.func @transform_4(%arg0: i32, %arg1: i32) -> (i32, i32, i32) {
    %c0_i32 = arith.constant 0 : i32
    %c0_i32_0 = arith.constant 0 : i32
    return %arg0, %arg1, %c0_i32 : i32, i32, i32
  }
}

</mosaic_0001>

<bundles_post_ra>
// kernel: tpu_custom_call.1
= control target key start
LH: loop header
LB: loop body
LE: loop exit
PB: predicated region body
PF: predicated region fallthrough
CT: control target
= control target key end

     0   :  { %s1568_s0 = inlined_call_operand.hbm [shape: bf16[2,32,128], index: 0, kind: input, shape index: {}]   ;;  %s1569_s1 = inlined_call_operand.hbm [shape: bf16[128,384], index: 1, kind: input, shape index: {}]   ;;  %s1570_s2 = inlined_call_operand.hbm [shape: bf16[2,32,128], index: 2, kind: output, shape index: {0}]   ;;  %s1571_s3 = inlined_call_operand.hbm [shape: bf16[2,32,128], index: 3, kind: output, shape index: {1}]   ;;  %s1572_s4 = inlined_call_operand.hbm [shape: bf16[2,32,128], index: 4, kind: output, shape index: {2}]  }
   0x1   :  { %1579 = sst [smem:[#allocation19_spill]] %s1569_s1 }
   0x2   :  { %1580 = sst [smem:[#allocation20_spill]] %s1572_s4 }
   0x3   :  { %10 = vsyncpa [#allocation3], 0 }
   0x4   :  { %12 = vsyncpa [#allocation3 + $0x1], 0 }
   0x5   :  { %13 = vsyncpa [#allocation6], 0 }
   0x6   :  { %14 = vsyncpa [#allocation4], 0 }
   0x7   :  { %16 = vsyncpa [#allocation4 + $0x1], 0 }
   0x8   :  { %17 = vsyncpa [#allocation9], 0 }
   0x9   :  { %19 = vsyncpa [#allocation9 + $0x1], 0  ;;  %s1289_s15 = smov 0   ;;  %s1291_s16 = smov 0  }
   0xa   :  { %s1293_s17 = smov 0   ;;  %s1295_s18 = smov 0  }
   0xb   :  { %s1297_s19 = smov 0   ;;  %s1299_s20 = smov 0  }
   0xc   :  { %s1301_s21 = smov 0   ;;  %s1303_s22 = smov 0  }
   0xd LB: > { %1581 = sst [smem:[#allocation15_spill]] %s1220_s15  ;;  %s1330_s23 = sadd.s32 4294967295, %s1248_s22   ;;  %s1248_s22 = sphi %s1303_s22, %s25_s22   ;;  %s1244_s21 = sphi %s1301_s21, %s1605_s21   ;;  %s1240_s20 = sphi %s1299_s20, %s1600_s20   ;;  %s1236_s19 = sphi %s1297_s19, %s1604_s19   ;;  %s1232_s18 = sphi %s1295_s18, %s1599_s18   ;;  %s1228_s17 = sphi %s1293_s17, %s1603_s17   ;;  %s1224_s16 = sphi %s1291_s16, %s1602_s16   ;;  %s1220_s15 = sphi %s1289_s15, %s1601_s15  }
   0xe   : > { %1582 = sst [smem:[#allocation16_spill]] %s1240_s20  ;;  %s1573_s24 = sadd.s32 4294967294, %s1248_s22  }
   0xf   : > { %p59_p0 = scmp.ne.s32.totalorder %s1224_s16, %s1220_s15  ;;  %p60_p1 = scmp.eq.s32.totalorder %s1330_s23, 0 }
  0x10   : > { %p112_p3 = scmp.eq.s32.totalorder %s1573_s24, 3  ;;  %p789_p5 = scmp.ge.s32.totalorder %s1248_s22, 1 }
  0x11   : > { %p1341_p4 = por %p60_p1, %p59_p0  ;;  %p175_p7 = scmp.lt.s32.totalorder %s1248_s22, 5 }
  0x12   : > { %p1346_p6 = por %p112_p3, %p59_p0  ;;  %s1250_s28 = smov [#allocation5]  }
  0x13   : > { %p1351_p8 = pnand %p789_p5, %p175_p7  ;;  %s187_s29 = sshll.u32 %s1250_s28, 4  ;;  %s188_s29 = int_to_ptr.vmem [resolvable:$true] %s187_s29 }
  0x14   : > { %s1584_s26 = scalar_select %p1346_p6, 1, 0 }
  0x15   : > { %p909_p9 = pneg %p1351_p8  ;;  %s1049_s30 = scalar_lea.vmem %s188_s29, 3072 }
  0x16   : > { %1585 = sst [smem:[#allocation17_spill]] %s1584_s26  ;;  %p1050_p12 = scmp.ne.s32.totalorder %s188_s29, %s1049_s30 }
  0x17   : > { %p910_p10 = pnand %p909_p9, %p60_p1  ;;  %p1057_p3 = scmp.lt.s32.totalorder %s188_s29, %s188_s29 }
  0x18   : > { %p1058_p2 = scmp.lt.s32.totalorder %s1049_s30, %s1049_s30 }
  0x19   : > { %p1040_p11 = pneg %p910_p10 }
  0x1a   : > { %p1059_p6 = por %p1058_p2, %p1057_p3 }
  0x1b   : > { %p1052_p13 = pnand %p1050_p12, %p1040_p11 }
  0x1d   : > { %p1053_p0 = pneg %p1052_p13 }
  0x1f   : > { %p1060_p5 = pnand %p1059_p6, %p1053_p0 }
  0x21   : > { %1063 = shalt.err (!%p1060_p5)
}
  0x22   : > { %s1251_s5 = smov 192   ;;  %s1252_s6 = smov 12  }
  0x23   : > { %s1587_s1 = sld [smem:[#allocation19_spill]]  ;;  %s34_s9 = sadd.s32 1, %s1240_s20 }
  0x24   : > { %p35_p2 = scmp.ge.s32.totalorder %s34_s9, 2  ;;  %s37_s10 = sadd.s32 1, %s1244_s21 }
  0x25   : > { %s46_s11 = sadd.s32 1, %s1228_s17  ;;  %p53_p6 = scmp.ne.s32.totalorder %s1228_s17, %s1224_s16 }
  0x26   : > { %s1607_s9 = smov (%p35_p2, %s34_s9), 0  ;;  %s1609_s10 = smov (!%p35_p2, %s37_s10), %s1244_s21 }
  0x27   : > { %1588 = sst [smem:[#allocation18_spill]] %s1607_s9  ;;  %s42_s12 = ssub.s32 %s1240_s20, %s1607_s9 }
  0x28   : > { %p54_p7 = scmp.eq.s32.totalorder %s1248_s22, 0  ;;  %p39_p9 = scmp.ge.s32.totalorder %s1609_s10, 2 }
  0x29   : > { %912 = dma.hbm_to_vmem [thread:$0]  (!%p910_p10), %s1587_s1, 3072, %s188_s29, [#allocation6], %s1251_s5, %s1251_s5, %s1252_s6  }
  0x2a   : > { %p1589_p11 = scmp.eq.s32.totalorder %s1330_s23, 3  ;;  %p1379_p10 = por %p54_p7, %p53_p6 }
  0x2b   : > { %p928_p13 = scmp.lt.s32.totalorder %s1248_s22, 4  ;;  %s1611_s10 = smov (%p39_p9, %s1609_s10), 0 }
  0x2c   : > { %p1375_p12 = por %p1589_p11, %p53_p6  ;;  %s201_s28 = sand.u32 1, %s1228_s17  }
  0x2d   : > { %s793_s29 = sshll.u32 %s1240_s20, 1  ;;  %s41_s30 = ssub.s32 %s1244_s21, %s1611_s10 }
  0x2e   : > { %s43_s5 = sor.u32 %s42_s12, %s41_s30  ;;  %s792_s6 = sshll.u32 %s201_s28, 3 }
  0x2f   : > { %p44_p0 = scmp.eq.s32.totalorder %s43_s5, 0  ;;  %s794_s7 = sshll.u32 %s1244_s21, 2 }
  0x30   : > { %s205_s8 = scalar_lea.vmem [#allocation2], %s792_s6  ;;  %s211_s9 = sadd.s32 %s794_s7, %s793_s29 }
  0x31   : > { %s214_s24 = sshll.u32 %s205_s8, 4  ;;  %s795_s26 = sshll.u32 %s211_s9, 6  ;;  %s215_s24 = int_to_ptr.vmem [resolvable:$true] %s214_s24 }
  0x32   : > { %s1392_s1 = scalar_select %p44_p0, %s1228_s17, %s46_s11  }
  0x33   : > { %p1398_p3 = pnand %p928_p13, %p1379_p10  ;;  %s213_s12 = scalar_lea.hbm %s1568_s0, %s795_s26 }
  0x34   : > { %s202_s30 = scalar_lea.sflag [#allocation3], %s201_s28  ;;  %s1077_s5 = scalar_lea.vmem %s215_s24, 128 }
  0x35   : > { %p1066_p5 = pneg %p1398_p3  ;;  %p1078_p2 = scmp.ne.s32.totalorder %s215_s24, %s1077_s5 }
  0x36   : > { %s1253_s11 = smov [#allocation2]  }
  0x37   : > { %p1080_p6 = pnand %p1078_p2, %p1066_p5  ;;  %s1082_s9 = sshll.u32 %s1253_s11, 4  ;;  %s1083_s9 = int_to_ptr.vmem [resolvable:$false] %s1082_s9 }
  0x38   : > { %s1084_s14 = scalar_lea.vmem %s1083_s9, 256  ;;  %p1085_p9 = scmp.lt.s32.totalorder %s215_s24, %s1083_s9 }
  0x39   : > { %p1081_p7 = pneg %p1080_p6  ;;  %p1086_p11 = scmp.lt.s32.totalorder %s1084_s14, %s1077_s5 }
  0x3b   : > { %p1087_p10 = por %p1086_p11, %p1085_p9 }
  0x3d   : > { %p1088_p13 = pnand %p1087_p10, %p1081_p7 }
  0x3f   : > { %1091 = shalt.err (!%p1088_p13)
}
  0x40   : > { %s1254_s29 = smov 64   ;;  %s1255_s4 = smov 4  }
  0x41   : > { %916 = dma.hbm_to_vmem [thread:$0]  (!%p1398_p3), %s213_s12, 128, %s215_s24, %s202_s30, %s1254_s29, %s1254_s29, %s1255_s4  }
  0x42   : > { %226 = sbr.rel (%p1351_p8) target bundleno = 373 (0x175), region = 28  ;;  %s1412_s20 = sand.u32 (!%p1351_p8), 1, %s1224_s16  }
  0x43   : > { %s1415_s26 = sshll.u32 (!%p1351_p8), %s1412_s20, 3  ;;  %s229_s28 = scalar_lea.sflag (!%p1351_p8), [#allocation3], %s1412_s20 }
  0x44   : > { %s232_s6 = scalar_lea.vmem (!%p1351_p8), [#allocation2], %s1415_s26 }
  0x47   : > { %1203 = dma.done.wait (%p1341_p4), %s229_s28, 128  }
  0x48   : > { %1205 = vsyncadd (%p1341_p4), %s229_s28, 4294967168 }
  0x49   : > { %1207 = dma.done.wait (%p60_p1), [#allocation6], 3072  }
  0x4a   : > { %1209 = vsyncadd (%p60_p1), [#allocation6], 4294964224  ;;  %v1256_v0 = vmov 0.0   ;;  %vm1257_vm0 = vmmov 0   ;;  %v1258_v1 = vmov 0   ;;  %v1037_v26 = vld [vmem:[%s232_s6] sm:$0xff]  }
  0x4b   : > { %877 = vmatprep.subr.bf16.mxu1 %v1256_v0  ;;  %893 = vmatprep.mubr.msk.bf16.mxu1 %vm1257_vm0, %v1256_v0  ;;  %v1005_v2 = vld [vmem:[#allocation5 + $0xac] ss:$12 sps:$4 sm:$0xff]   ;;  %v1007_v3 = vld [vmem:[#allocation5 + $0xb0] ss:$12 sps:$4 sm:$0xff]   ;;  %v1008_v4 = vld [vmem:[#allocation5 + $0xa8] ss:$12 sps:$4 sm:$0xff]  }
  0x4c   : > { %476 = vmatprep.mubr.bf16.mxu0 %v1258_v1  ;;  %444 = vmatprep.subr.bf16.mxu0 %v1005_v2  ;;  %v1009_v5 = vld [vmem:[#allocation5 + $0x94] ss:$12 sps:$4 sm:$0xff]   ;;  %v1011_v6 = vld [vmem:[#allocation5 + $0x98] ss:$12 sps:$4 sm:$0xff]   ;;  %v1012_v7 = vld [vmem:[#allocation5 + $0x90] ss:$12 sps:$4 sm:$0xff]  }
  0x4d   : > { %878 = vmatpush3.bf16.msra.mxu1 %v1007_v3  ;;  %445 = vmatpush1.bf16.msra.mxu0 %v1008_v4  ;;  %v1013_v8 = vld [vmem:[#allocation5 + $0x7c] ss:$12 sps:$4 sm:$0xff]   ;;  %v1015_v9 = vld [vmem:[#allocation5 + $0x80] ss:$12 sps:$4 sm:$0xff]   ;;  %v1016_v10 = vld [vmem:[#allocation5 + $0x78] ss:$12 sps:$4 sm:$0xff]  }
  0x4e   : > { %879 = vmatprep.subr.bf16.mxu1 %v1256_v0  ;;  %446 = vmatprep.subr.bf16.mxu0 %v1009_v5  ;;  %v1017_v11 = vld [vmem:[#allocation5 + $0x64] ss:$12 sps:$4 sm:$0xff]   ;;  %v1019_v12 = vld [vmem:[#allocation5 + $0x68] ss:$12 sps:$4 sm:$0xff]   ;;  %v1020_v13 = vld [vmem:[#allocation5 + $0x60] ss:$12 sps:$4 sm:$0xff]  }
  0x4f   : > { %v1021_v14 = vld [vmem:[#allocation5 + $0x4c] ss:$12 sps:$4 sm:$0xff]   ;;  %v1023_v15 = vld [vmem:[#allocation5 + $0x50] ss:$12 sps:$4 sm:$0xff]   ;;  %v1024_v16 = vld [vmem:[#allocation5 + $0x48] ss:$12 sps:$4 sm:$0xff]  }
  0x50   : > { %v1025_v17 = vld [vmem:[#allocation5 + $0x34] ss:$12 sps:$4 sm:$0xff]   ;;  %v1027_v18 = vld [vmem:[#allocation5 + $0x38] ss:$12 sps:$4 sm:$0xff]   ;;  %v1028_v19 = vld [vmem:[#allocation5 + $0x30] ss:$12 sps:$4 sm:$0xff]  }
  0x51   : > { %880 = vmatpush3.bf16.msra.mxu1 %v1011_v6  ;;  %447 = vmatpush1.bf16.msra.mxu0 %v1012_v7  ;;  %v1029_v20 = vld [vmem:[#allocation5 + $0x1c] ss:$12 sps:$4 sm:$0xff]   ;;  %v1031_v21 = vld [vmem:[#allocation5 + $0x20] ss:$12 sps:$4 sm:$0xff]   ;;  %v1032_v22 = vld [vmem:[#allocation5 + $0x18] ss:$12 sps:$4 sm:$0xff]  }
  0x52   : > { %881 = vmatprep.subr.bf16.mxu1 %v1256_v0  ;;  %448 = vmatprep.subr.bf16.mxu0 %v1013_v8  ;;  %v1033_v23 = vld [vmem:[#allocation5 + $0x4] ss:$12 sps:$4 sm:$0xff]   ;;  %v1035_v24 = vld [vmem:[#allocation5 + $0x8] ss:$12 sps:$4 sm:$0xff]   ;;  %v1036_v25 = vld [vmem:[#allocation5] ss:$12 sps:$4 sm:$0xff]  }
  0x53   : > { %s836_s15 = sshll.u32 %s1232_s18, 1  ;;  %s837_s24 = sshll.u32 %s1236_s19, 2 }
  0x54   : > { %s270_s25 = scalar_lea.vmem [#allocation10], %s1415_s26  ;;  %s256_s7 = scalar_lea.vmem [#allocation7], %s1415_s26 }
  0x55   : > { %882 = vmatpush3.bf16.msra.mxu1 %v1015_v9  ;;  %449 = vmatpush1.bf16.msra.mxu0 %v1016_v10  ;;  %s620_s27 = sshll.u32 %s270_s25, 4  ;;  %s584_s8 = sshll.u32 %s256_s7, 4  ;;  %s1433_s27 = int_to_ptr.vmem [resolvable:$true] %s620_s27  ;;  %s1435_s8 = int_to_ptr.vmem [resolvable:$true] %s584_s8 }
  0x56   : > { %883 = vmatprep.subr.bf16.mxu1 %v1256_v0  ;;  %450 = vmatprep.subr.bf16.mxu0 %v1017_v11  ;;  %s581_s12 = sadd.s32 %s837_s24, %s836_s15  ;;  %s263_s18 = scalar_lea.vmem [#allocation8], %s1415_s26 }
  0x57   : > { %s838_s30 = sshll.u32 %s581_s12, 6  ;;  %s602_s19 = sshll.u32 %s263_s18, 4  ;;  %s1446_s19 = int_to_ptr.vmem [resolvable:$true] %s602_s19 }
  0x58   : > { %s1444_s14 = scalar_lea.hbm %s1570_s2, %s838_s30  ;;  %s1451_s28 = scalar_lea.hbm %s1571_s3, %s838_s30 }
  0x59   : > { %884 = vmatpush3.bf16.msra.mxu1 %v1019_v12  ;;  %451 = vmatpush1.bf16.msra.mxu0 %v1020_v13  ;;  %s1593_s24 = sld [smem:[#allocation20_spill]]  ;;  %s559_s11 = scalar_lea.sflag [#allocation4], %s1412_s20 }
  0x5a   : > { %885 = vmatprep.subr.bf16.mxu1 %v1256_v0  ;;  %452 = vmatprep.subr.bf16.mxu0 %v1021_v14  ;;  %s1092_s9 = scalar_lea.vmem %s1435_s8, 128 }
  0x5b   : > { %p1093_p1 = scmp.ne.s32.totalorder %s1435_s8, %s1092_s9 }
  0x5d   : > { %886 = vmatpush3.bf16.msra.mxu1 %v1023_v15  ;;  %453 = vmatpush1.bf16.msra.mxu0 %v1024_v16  ;;  %p1094_p4 = pnand %p1093_p1, %p1375_p12 }
  0x5e   : > { %887 = vmatprep.subr.bf16.mxu1 %v1256_v0  ;;  %454 = vmatprep.subr.bf16.mxu0 %v1025_v17 }
  0x5f   : > { %s1456_s12 = scalar_lea.hbm %s1593_s24, %s838_s30  ;;  %p1095_p8 = pneg %p1094_p4 }
  0x61   : > { %888 = vmatpush3.bf16.msra.mxu1 %v1027_v18  ;;  %455 = vmatpush1.bf16.msra.mxu0 %v1028_v19 }
  0x62   : > { %889 = vmatprep.subr.bf16.mxu1 %v1256_v0  ;;  %456 = vmatprep.subr.bf16.mxu0 %v1029_v20 }
  0x65   : > { %890 = vmatpush3.bf16.msra.mxu1 %v1031_v21  ;;  %457 = vmatpush1.bf16.msra.mxu0 %v1032_v22 }
  0x66   : > { %891 = vmatprep.subr.bf16.mxu1 %v1256_v0  ;;  %458 = vmatprep.subr.bf16.mxu0 %v1033_v23 }
  0x69   : > { %892 = vmatpush3.bf16.msra.mxu1 %v1035_v24  ;;  %459 = vmatpush1.bf16.msra.mxu0 %v1036_v25 }
  0x6c   : > { %894 = vmatmul.mubr.bf16.vlgmr.msra.gmra.mxu1 %v1037_v26  ;;  %477 = vmatmul.mubr.bf16.vlgmr.msra.gmra.mxu0 %v1037_v26 }
 0x12c   : > { %v521_v27 = vpop.f32.mrf.mxu1  ;;  %v478_v28 = vpop.f32.mrf.mxu0 }
 0x12e   : > { %v895_v29 = vpop.f32.mrf.mxu1  ;;  %v480_v30 = vpop.f32.mrf.mxu0 }
 0x130   : > { %v524_v31 = vpop.f32.mrf.mxu1  ;;  %v482_v33 = vpop.f32.mrf.mxu0 }
 0x131   : > { %v866_v32 = vpack.c.bf16 %v524_v31, %v521_v27  ;;  %v856_v34 = vpack.c.bf16 %v482_v33, %v478_v28 }
 0x132   : > { %v896_v35 = vpop.f32.mrf.mxu1  ;;  %v484_v36 = vpop.f32.mrf.mxu0 }
 0x133   : > { %867 = vst [vmem:[%s270_s25] sm:$0xff] %v866_v32   ;;  %857 = vst [vmem:[%s256_s7] sm:$0xff] %v856_v34   ;;  %v861_v37 = vpack.c.bf16 %v484_v36, %v480_v30  ;;  %s1259_s25 = smov [#allocation7]  }
 0x134   : > { %s1096_s5 = sshll.u32 %s1259_s25, 4  ;;  %s1097_s5 = int_to_ptr.vmem [resolvable:$false] %s1096_s5 }
 0x135   : > { %s1098_s7 = scalar_lea.vmem %s1097_s5, 256  ;;  %p1099_p0 = scmp.lt.s32.totalorder %s1435_s8, %s1097_s5 }
 0x136   : > { %p1100_p3 = scmp.lt.s32.totalorder %s1098_s7, %s1092_s9 }
 0x138   : > { %p1101_p5 = por %p1100_p3, %p1099_p0 }
 0x13a   : > { %p1102_p2 = pnand %p1101_p5, %p1095_p8 }
 0x13c   : > { %1105 = shalt.err (!%p1102_p2)
}
 0x13d   : > { %s1106_s30 = scalar_lea.hbm %s1444_s14, 128  ;;  %s1110_s6 = scalar_lea.hbm %s1570_s2, 512 }
 0x13e   : > { %p1107_p6 = scmp.ne.s32.totalorder %s1444_s14, %s1106_s30  ;;  %p1111_p11 = scmp.lt.s32.totalorder %s1444_s14, %s1570_s2 }
 0x13f   : > { %p1112_p10 = scmp.lt.s32.totalorder %s1110_s6, %s1106_s30 }
 0x140   : > { %p1108_p7 = pnand %p1107_p6, %p1375_p12 }
 0x141   : > { %p1113_p13 = por %p1112_p10, %p1111_p11 }
 0x142   : > { %p1109_p9 = pneg %p1108_p7 }
 0x144   : > { %p1114_p1 = pnand %p1113_p13, %p1109_p9 }
 0x146   : > { %1117 = shalt.err (!%p1114_p1)
}
 0x147   : > { %s1260_s5 = smov 64   ;;  %s1261_s9 = smov 4   ;;  %862 = vst [vmem:[%s263_s18] sm:$0xff] %v861_v37  }
 0x148   : > { %903 = dma.vmem_to_hbm [thread:$0]  (%p1375_p12), %s1435_s8, 128, %s1444_s14, %s559_s11, %s1260_s5, %s1260_s5, %s1261_s9  }
 0x149   : > { %s1594_s7 = sand.u32 1, %s1330_s23   ;;  %s1118_s29 = scalar_lea.vmem %s1446_s19, 128 }
 0x14a   : > { %s1488_s30 = scalar_lea.sflag [#allocation9], %s1594_s7  ;;  %p1119_p4 = scmp.ne.s32.totalorder %s1446_s19, %s1118_s29 }
 0x14b   : > { %s1262_s4 = smov [#allocation8]  }
 0x14c   : > { %p1120_p8 = pnand %p1119_p4, %p1375_p12  ;;  %s1122_s6 = sshll.u32 %s1262_s4, 4  ;;  %s1123_s6 = int_to_ptr.vmem [resolvable:$false] %s1122_s6 }
 0x14d   : > { %s1124_s15 = scalar_lea.vmem %s1123_s6, 256  ;;  %p1125_p3 = scmp.lt.s32.totalorder %s1446_s19, %s1123_s6 }
 0x14e   : > { %p1121_p0 = pneg %p1120_p8  ;;  %p1126_p5 = scmp.lt.s32.totalorder %s1124_s15, %s1118_s29 }
 0x150   : > { %p1127_p2 = por %p1126_p5, %p1125_p3 }
 0x152   : > { %p1128_p6 = pnand %p1127_p2, %p1121_p0 }
 0x154   : > { %1131 = shalt.err (!%p1128_p6)
}
 0x155   : > { %s1132_s23 = scalar_lea.hbm %s1451_s28, 128  ;;  %s1136_s8 = scalar_lea.hbm %s1571_s3, 512 }
 0x156   : > { %p1133_p7 = scmp.ne.s32.totalorder %s1451_s28, %s1132_s23  ;;  %p1137_p10 = scmp.lt.s32.totalorder %s1451_s28, %s1571_s3 }
 0x157   : > { %p1138_p13 = scmp.lt.s32.totalorder %s1136_s8, %s1132_s23 }
 0x158   : > { %p1134_p9 = pnand %p1133_p7, %p1375_p12 }
 0x159   : > { %p1139_p1 = por %p1138_p13, %p1137_p10 }
 0x15a   : > { %p1135_p11 = pneg %p1134_p9 }
 0x15c   : > { %p1140_p4 = pnand %p1139_p1, %p1135_p11 }
 0x15e   : > { %1143 = shalt.err (!%p1140_p4)
}
 0x15f   : > { %904 = dma.vmem_to_hbm [thread:$0]  (%p1375_p12), %s1446_s19, 128, %s1451_s28, %s1488_s30, %s1260_s5, %s1260_s5, %s1261_s9  }
 0x160   : > { %s1144_s11 = scalar_lea.vmem %s1433_s27, 128  ;;  %s1263_s25 = smov [#allocation10]  }
 0x161   : > { %p1145_p8 = scmp.ne.s32.totalorder %s1433_s27, %s1144_s11  ;;  %s1148_s7 = sshll.u32 %s1263_s25, 4  ;;  %s1149_s7 = int_to_ptr.vmem [resolvable:$false] %s1148_s7 }
 0x162   : > { %s1150_s29 = scalar_lea.vmem %s1149_s7, 256  ;;  %p1151_p5 = scmp.lt.s32.totalorder %s1433_s27, %s1149_s7 }
 0x163   : > { %p1146_p0 = pnand %p1145_p8, %p1375_p12  ;;  %p1152_p2 = scmp.lt.s32.totalorder %s1150_s29, %s1144_s11 }
 0x165   : > { %p1147_p3 = pneg %p1146_p0  ;;  %p1153_p6 = por %p1152_p2, %p1151_p5 }
 0x167   : > { %p1154_p7 = pnand %p1153_p6, %p1147_p3 }
 0x169   : > { %1157 = shalt.err (!%p1154_p7)
}
 0x16a   : > { %s1158_s4 = scalar_lea.hbm %s1456_s12, 128  ;;  %s1162_s6 = scalar_lea.hbm %s1593_s24, 512 }
 0x16b   : > { %p1159_p9 = scmp.ne.s32.totalorder %s1456_s12, %s1158_s4  ;;  %p1163_p13 = scmp.lt.s32.totalorder %s1456_s12, %s1593_s24 }
 0x16c   : > { %p1164_p1 = scmp.lt.s32.totalorder %s1162_s6, %s1158_s4 }
 0x16d   : > { %p1160_p11 = pnand %p1159_p9, %p1375_p12 }
 0x16e   : > { %p1165_p4 = por %p1164_p1, %p1163_p13 }
 0x16f   : > { %p1161_p10 = pneg %p1160_p11 }
 0x171   : > { %p1166_p8 = pnand %p1165_p4, %p1161_p10 }
 0x173   : > { %1169 = shalt.err (!%p1166_p8)
}
 0x174   : > { %905 = dma.vmem_to_hbm [thread:$0]  (%p1375_p12), %s1433_s27, 128, %s1456_s12, %s1488_s30, %s1260_s5, %s1260_s5, %s1261_s9  }
 0x175 PF: > { %s1595_s20 = sld [smem:[#allocation15_spill]]  ;;  %p930_p0 = scmp.ge.s32.totalorder %s1248_s22, 2 }
 0x176   : > { %s1596_s26 = sld [smem:[#allocation17_spill]] }
 0x17b   : > { %s635_s8 = sand.u32 1, %s1595_s20  }
 0x17c   : > { %p1597_p3 = scmp.ne.s32.totalorder %s1596_s26, 0  ;;  %s636_s18 = scalar_lea.sflag [#allocation4], %s635_s8 }
 0x17e   : > { %p918_p5 = pnand %p930_p0, %p1597_p3 }
 0x180   : > { %p919_p2 = pneg %p918_p5 }
 0x182   : > { %1211 = dma.done.wait (%p919_p2), %s636_s18, 128  }
 0x183   : > { %1213 = vsyncadd (%p919_p2), %s636_s18, 4294967168  ;;  %s1598_s13 = sadd.s32 4294967294, %s1248_s22  }
 0x184   : > { %s644_s14 = sand.u32 1, %s1598_s13  }
 0x185   : > { %s645_s11 = scalar_lea.sflag [#allocation9], %s644_s14 }
 0x186   : > { %1215 = dma.done.wait (%p919_p2), %s645_s11, 256  }
 0x187   : > { %1217 = vsyncadd (%p919_p2), %s645_s11, 4294967040  ;;  %s25_s22 = sadd.s32 1, %s1248_s22   ;;  %s1599_s18 = sld [smem:[#allocation16_spill]] }
 0x188   : > { %p22_p12 = scmp.ge.s32.totalorder %s25_s22, 6   ;;  %s1600_s20 = sld [smem:[#allocation18_spill]] }
 0x189   : > { %s1601_s15 = smov %s1224_s16  ;;  %s1602_s16 = smov %s1228_s17 }
 0x18a   : > { %s1603_s17 = smov %s1392_s1  ;;  %s1604_s19 = smov %s1244_s21 }
 0x18b   : > { %s1605_s21 = smov %s1611_s10  ;;  %24 = sbr.rel (!%p22_p12) target bundleno = 13 (0xd), region = 109 }
 0x190   :  { %659 = vsyncpa [#allocation3], 1 }
 0x191   :  { %661 = vsyncpa [#allocation3 + $0x1], 1 }
 0x192   :  { %662 = vsyncpa [#allocation6], 1 }
 0x193   :  { %663 = vsyncpa [#allocation4], 1 }
 0x194   :  { %665 = vsyncpa [#allocation4 + $0x1], 1 }
 0x195   :  { %666 = vsyncpa [#allocation9], 1 }
 0x196   :  { %668 = vsyncpa [#allocation9 + $0x1], 1 }

</bundles_post_ra>
